<compile_context>
chip_gen: v7x
topology: tpu7x:2x2x1
jax: 0.10.0
libtpu: 0.0.40
codegen_flags: <defaults>
</compile_context>

<pallas_src>
import functools

import jax
import jax.numpy as jnp
from jax import lax
from jax.experimental import pallas as pl
from jax.experimental.pallas import tpu as pltpu

_LANE = 128   # vreg lane width
_SUBLANE = 8  # f32 sublane count


def _round_up(n: int, m: int) -> int:
    return ((n + m - 1) // m) * m


def prepare_params(w1, b1, w2, b2, *, param_dtype=jnp.bfloat16):
    """One-time parameter preparation (hoisted out of the per-call forward).

    * Lane dims (W1/W2 columns, biases, output columns) are zero-padded to a
      multiple of 128. tanh(0) = 0, so padded hidden/output columns stay
      exactly zero and never leak into real outputs. (If the activation ever
      changes to one with f(0) != 0 this padding scheme must be revisited.)
    * Weights are stored in bf16 for the MXU (more throughput, half the DMA
      bytes); biases stay f32 since bias add + tanh run on the f32 VPU/EUP.
    * Biases are normalized to (1, dim) whether the caller passes
      PyTorch-style 1-D or already-2-D biases.
    """
    ebd_dim, hid_dim = w1.shape
    assert w2.shape == (hid_dim, ebd_dim)
    hp = _round_up(hid_dim, _LANE)
    ep = _round_up(ebd_dim, _LANE)
    b1 = jnp.reshape(b1, (1, hid_dim)).astype(jnp.float32)
    b2 = jnp.reshape(b2, (1, ebd_dim)).astype(jnp.float32)
    return {
        "w1": jnp.pad(w1, ((0, 0), (0, hp - hid_dim))).astype(param_dtype),
        "b1": jnp.pad(b1, ((0, 0), (0, hp - hid_dim))),
        "w2": jnp.pad(w2, ((0, hp - hid_dim), (0, ep - ebd_dim))).astype(param_dtype),
        "b2": jnp.pad(b2, ((0, 0), (0, ep - ebd_dim))),
        "ebd_dim": ebd_dim,
        "hid_dim": hid_dim,
    }


def _mlp(x_f32, w1, b1, w2, b2):
    """tanh(tanh(x @ W1 + b1) @ W2 + b2).

    bf16 MXU inputs (both operands cast explicitly), f32 accumulation via
    preferred_element_type, f32 bias add + tanh on the VPU/EUP.
    """
    h = jnp.tanh(
        jnp.dot(x_f32.astype(jnp.bfloat16), w1.astype(jnp.bfloat16),
                preferred_element_type=jnp.float32)
        + b1.astype(jnp.float32))
    return jnp.tanh(
        jnp.dot(h.astype(jnp.bfloat16), w2.astype(jnp.bfloat16),
                preferred_element_type=jnp.float32)
        + b2.astype(jnp.float32))


def _ode_forward_kernel(x_ref, w1_ref, b1_ref, w2_ref, b2_ref, o_ref):
    # NOTE: at H, E ~ 128 with bf16 matmuls the single EUP (the two tanh's)
    # can become the binding unit on v6e/v7x; keeping the elementwise path in
    # f32 costs nothing in that regime.
    y = _mlp(x_ref[...].astype(jnp.float32),
             w1_ref[...], b1_ref[...], w2_ref[...], b2_ref[...])
    o_ref[...] = y.astype(o_ref.dtype)


def _ode_euler_kernel(x_ref, w1_ref, b1_ref, w2_ref, b2_ref, o_ref, *,
                      num_steps, dt, ebd_dim):
    # Fused fixed-step Euler solve: every f(t, y) evaluation reuses the
    # VMEM-resident weights; only the state tile is carried between steps.
    y0 = x_ref[...].astype(jnp.float32)

    def step(_, y):
        f = _mlp(y, w1_ref[...], b1_ref[...], w2_ref[...], b2_ref[...])
        # f is lane-padded to Ep; slice back to the real ebd_dim columns.
        return y + dt * f[:, :ebd_dim]

    y = lax.fori_loop(0, num_steps, step, y0, unroll=(num_steps <= 8))
    o_ref[...] = y.astype(o_ref.dtype)


def _resident_spec(shape, single_buffer):
    """Weights/biases: constant index_map -> DMA'd once, resident in VMEM."""
    index_map = lambda i: (0,) * len(shape)
    if single_buffer:
        # Double-buffering a block that never changes is pure VMEM waste
        # (matters on v7x's 64 MiB VMEM once E/H grow).
        return pl.BlockSpec(shape, index_map, pipeline_mode=pl.Buffered(1))
    return pl.BlockSpec(shape, index_map)


def _choose_batch_tile(batch, batch_tile):
    if batch <= _SUBLANE:
        return _SUBLANE
    if batch <= batch_tile:
        # Ensure >= 2 batch tiles so the "parallel" grid axis can shard across
        # v7x's two TensorCores (harmless on single-TC v5e/v6e).
        return _round_up((batch + 1) // 2, _SUBLANE)
    return batch_tile


def _run_tiled(kernel_fn, x, params, out_cols, batch_tile):
    batch, ebd_dim = x.shape
    assert ebd_dim == params["ebd_dim"]
    w1, b1, w2, b2 = params["w1"], params["b1"], params["w2"], params["b2"]
    hp = w1.shape[1]
    ep = w2.shape[1]
    tb = _choose_batch_tile(batch, batch_tile)
    grid = (pl.cdiv(batch, tb),)  # ragged tail tile handled by Pallas masking

    # TODO(synk): for large E/H add a K-tiling grid axis ("arbitrary") with an
    # f32 VMEM accumulator and an explicit vmem_limit_bytes so the resident
    # weights fit v7x's 64 MiB VMEM.
    def run(single_buffer_weights):
        return pl.pallas_call(
            kernel_fn,
            out_shape=jax.ShapeDtypeStruct((batch, out_cols), x.dtype),
            grid_spec=pltpu.PrefetchScalarGridSpec(
                num_scalar_prefetch=0,
                grid=grid,
                in_specs=[
                    # x streamed one batch tile per step; feature dim left
                    # unpadded (full-dim last block dim is legal and avoids a
                    # per-call padding copy + extra HBM DMA).
                    pl.BlockSpec((tb, ebd_dim), lambda i: (i, 0)),
                    _resident_spec((ebd_dim, hp), single_buffer_weights),
                    _resident_spec((1, hp), single_buffer_weights),
                    _resident_spec((hp, ep), single_buffer_weights),
                    _resident_spec((1, ep), single_buffer_weights),
                ],
                out_specs=pl.BlockSpec((tb, out_cols), lambda i: (i, 0)),
            ),
            compiler_params=pltpu.CompilerParams(
                dimension_semantics=("parallel",),
            ),
        )(x, w1, b1, w2, b2)

    try:
        return run(True)
    except Exception:
        # pipeline_mode=pl.Buffered(1) not supported by this jax/libtpu ->
        # fall back to default double-buffered weight blocks (identical math).
        return run(False)


def ode_func_forward(x, params, *, batch_tile=1024):
    """ODEFunc.forward(t, x): `t` is unused; dropout_layer is never applied."""
    ebd_dim = params["ebd_dim"]
    ep = params["w2"].shape[1]
    # Output block is lane-padded to Ep -> unmasked, lane-dense stores; padded
    # columns are exactly zero (tanh(0) = 0) and sliced off here.
    out = _run_tiled(_ode_forward_kernel, x, params, out_cols=ep,
                     batch_tile=batch_tile)
    return out if ep == ebd_dim else out[:, :ebd_dim]


def ode_func_euler_solve(x0, params, *, num_steps, dt, batch_tile=1024):
    """Fixed-step Euler solve of dy/dt = ODEFunc(t, y), fused into a single
    pallas_call so W1/b1/W2/b2 are DMA'd into VMEM once per solve instead of
    once per f evaluation."""
    ebd_dim = params["ebd_dim"]
    kernel = functools.partial(_ode_euler_kernel, num_steps=int(num_steps),
                               dt=float(dt), ebd_dim=ebd_dim)
    return _run_tiled(kernel, x0, params, out_cols=ebd_dim,
                      batch_tile=batch_tile)


if __name__ == "__main__":
    batch, ebd_dim, hid_dim = 8, 32, 64

    key = jax.random.PRNGKey(0)
    kx, k1, k2, k3, k4 = jax.random.split(key, 5)

    x = jax.random.normal(kx, (batch, ebd_dim), dtype=jnp.float32)

    # PyTorch stores Linear.weight as (out, in); we use the transpose (in, out)
    # so the kernel computes x @ W. Biases are PyTorch-style 1-D here.
    s1 = ebd_dim ** -0.5
    s2 = hid_dim ** -0.5
    w1 = jax.random.uniform(k1, (ebd_dim, hid_dim), jnp.float32, -s1, s1)
    b1 = jax.random.uniform(k2, (hid_dim,), jnp.float32, -s1, s1)
    w2 = jax.random.uniform(k3, (hid_dim, ebd_dim), jnp.float32, -s2, s2)
    b2 = jax.random.uniform(k4, (ebd_dim,), jnp.float32, -s2, s2)

    # One-time parameter prep (padding + bf16 cast hoisted out of the forward).
    params = prepare_params(w1, b1, w2, b2)

    # Single forward evaluation (== ODEFunc.forward(t, x)).
    out = jax.block_until_ready(ode_func_forward(x, params))
    ref = jnp.tanh(jnp.tanh(x @ w1 + b1[None, :]) @ w2 + b2[None, :])
    assert out.shape == (batch, ebd_dim)
    assert bool(jnp.allclose(out, ref, atol=5e-2, rtol=5e-2)), \
        float(jnp.max(jnp.abs(out - ref)))

    # Fused multi-evaluation solve (weights stay resident across all f calls).
    num_steps, dt = 4, 0.1
    y = jax.block_until_ready(
        ode_func_euler_solve(x, params, num_steps=num_steps, dt=dt))
    y_ref = x
    for _ in range(num_steps):
        y_ref = y_ref + dt * jnp.tanh(
            jnp.tanh(y_ref @ w1 + b1[None, :]) @ w2 + b2[None, :])
    assert y.shape == (batch, ebd_dim)
    assert bool(jnp.allclose(y, y_ref, atol=5e-2, rtol=5e-2)), \
        float(jnp.max(jnp.abs(y - y_ref)))

    print("KERNEL_OK")
</pallas_src>

<mosaic_0001>
module attributes {stable_mosaic.version = 11 : i64} {
  func.func @_ode_forward_kernel(%arg0: i32, %arg1: memref<8x32xf32, #tpu.memory_space<vmem>>, %arg2: memref<32x128xbf16, #tpu.memory_space<vmem>>, %arg3: memref<1x128xf32, #tpu.memory_space<vmem>>, %arg4: memref<128x128xbf16, #tpu.memory_space<vmem>>, %arg5: memref<1x128xf32, #tpu.memory_space<vmem>>, %arg6: memref<8x128xf32, #tpu.memory_space<vmem>>) attributes {dimension_semantics = [#tpu.dimension_semantics<parallel>], iteration_bounds = array<i64: 1>, scalar_prefetch = 0 : i64, scratch_operands = 0 : i64, tpu.core_type = #tpu.core_type<tc>, window_params = [{transform_indices = @transform_0, window_bounds = array<i64: 8, 32>}, {pipeline_mode = #tpu.pipeline_mode<synchronous>, transform_indices = @transform_1, window_bounds = array<i64: 32, 128>}, {pipeline_mode = #tpu.pipeline_mode<synchronous>, transform_indices = @transform_2, window_bounds = array<i64: 1, 128>}, {pipeline_mode = #tpu.pipeline_mode<synchronous>, transform_indices = @transform_3, window_bounds = array<i64: 128, 128>}, {pipeline_mode = #tpu.pipeline_mode<synchronous>, transform_indices = @transform_4, window_bounds = array<i64: 1, 128>}, {transform_indices = @transform_5, window_bounds = array<i64: 8, 128>}]} {
    %c0 = arith.constant 0 : index
    %c0_0 = arith.constant 0 : index
    %0 = vector.load %arg1[%c0, %c0_0] : memref<8x32xf32, #tpu.memory_space<vmem>>, vector<8x32xf32>
    %c0_1 = arith.constant 0 : index
    %c0_2 = arith.constant 0 : index
    %1 = vector.load %arg2[%c0_1, %c0_2] : memref<32x128xbf16, #tpu.memory_space<vmem>>, vector<32x128xbf16>
    %c0_3 = arith.constant 0 : index
    %c0_4 = arith.constant 0 : index
    %2 = vector.load %arg3[%c0_3, %c0_4] : memref<1x128xf32, #tpu.memory_space<vmem>>, vector<1x128xf32>
    %c0_5 = arith.constant 0 : index
    %c0_6 = arith.constant 0 : index
    %3 = vector.load %arg4[%c0_5, %c0_6] : memref<128x128xbf16, #tpu.memory_space<vmem>>, vector<128x128xbf16>
    %c0_7 = arith.constant 0 : index
    %c0_8 = arith.constant 0 : index
    %4 = vector.load %arg5[%c0_7, %c0_8] : memref<1x128xf32, #tpu.memory_space<vmem>>, vector<1x128xf32>
    %5 = arith.truncf %0 : vector<8x32xf32> to vector<8x32xbf16>
    %cst = arith.constant dense<0.000000e+00> : vector<8x128xf32>
    %6 = tpu.matmul %5, %1, %cst {dimension_numbers = #tpu.dot_dimension_numbers<[1], [0], [0], [1], [0, 0, 1, 1], [], []>} : vector<8x32xbf16>, vector<32x128xbf16>, vector<8x128xf32> -> vector<8x128xf32>
    %7 = vector.broadcast %2 : vector<1x128xf32> to vector<8x128xf32>
    %8 = arith.addf %6, %7 : vector<8x128xf32>
    %9 = math.tanh %8 : vector<8x128xf32>
    %10 = arith.truncf %9 : vector<8x128xf32> to vector<8x128xbf16>
    %cst_9 = arith.constant dense<0.000000e+00> : vector<8x128xf32>
    %11 = tpu.matmul %10, %3, %cst_9 {dimension_numbers = #tpu.dot_dimension_numbers<[1], [0], [0], [1], [0, 0, 1, 1], [], []>} : vector<8x128xbf16>, vector<128x128xbf16>, vector<8x128xf32> -> vector<8x128xf32>
    %12 = vector.broadcast %4 : vector<1x128xf32> to vector<8x128xf32>
    %13 = arith.addf %11, %12 : vector<8x128xf32>
    %14 = math.tanh %13 : vector<8x128xf32>
    %c0_10 = arith.constant 0 : index
    %c0_11 = arith.constant 0 : index
    %15 = vector.load %arg6[%c0_10, %c0_11] : memref<8x128xf32, #tpu.memory_space<vmem>>, vector<8x128xf32>
    tpu.vector_store %arg6[%c0_10, %c0_11], %14 {strides = array<i32>} : memref<8x128xf32, #tpu.memory_space<vmem>>, vector<8x128xf32>,
    return
  }
  func.func @transform_0(%arg0: i32) -> (i32, i32) {
    %c0_i32 = arith.constant 0 : i32
    %c0_i32_0 = arith.constant 0 : i32
    return %arg0, %c0_i32 : i32, i32
  }
  func.func @transform_1(%arg0: i32) -> (i32, i32) {
    %c0_i32 = arith.constant 0 : i32
    %c0_i32_0 = arith.constant 0 : i32
    %c0_i32_1 = arith.constant 0 : i32
    return %c0_i32, %c0_i32_0 : i32, i32
  }
  func.func @transform_2(%arg0: i32) -> (i32, i32) {
    %c0_i32 = arith.constant 0 : i32
    %c0_i32_0 = arith.constant 0 : i32
    %c0_i32_1 = arith.constant 0 : i32
    return %c0_i32, %c0_i32_0 : i32, i32
  }
  func.func @transform_3(%arg0: i32) -> (i32, i32) {
    %c0_i32 = arith.constant 0 : i32
    %c0_i32_0 = arith.constant 0 : i32
    %c0_i32_1 = arith.constant 0 : i32
    return %c0_i32, %c0_i32_0 : i32, i32
  }
  func.func @transform_4(%arg0: i32) -> (i32, i32) {
    %c0_i32 = arith.constant 0 : i32
    %c0_i32_0 = arith.constant 0 : i32
    %c0_i32_1 = arith.constant 0 : i32
    return %c0_i32, %c0_i32_0 : i32, i32
  }
  func.func @transform_5(%arg0: i32) -> (i32, i32) {
    %c0_i32 = arith.constant 0 : i32
    %c0_i32_0 = arith.constant 0 : i32
    return %arg0, %c0_i32 : i32, i32
  }
}

module attributes {stable_mosaic.version = 11 : i64} {
  func.func @_ode_forward_kernel(%arg0: i32, %arg1: memref<8x32xf32, #tpu.memory_space<vmem>>, %arg2: memref<32x128xbf16, #tpu.memory_space<vmem>>, %arg3: memref<1x128xf32, #tpu.memory_space<vmem>>, %arg4: memref<128x128xbf16, #tpu.memory_space<vmem>>, %arg5: memref<1x128xf32, #tpu.memory_space<vmem>>, %arg6: memref<8x128xf32, #tpu.memory_space<vmem>>) attributes {dimension_semantics = [#tpu.dimension_semantics<parallel>], iteration_bounds = array<i64: 1>, scalar_prefetch = 0 : i64, scratch_operands = 0 : i64, tpu.core_type = #tpu.core_type<tc>, window_params = [{transform_indices = @transform_0, window_bounds = array<i64: 8, 32>}, {pipeline_mode = #tpu.pipeline_mode<synchronous>, transform_indices = @transform_1, window_bounds = array<i64: 32, 128>}, {pipeline_mode = #tpu.pipeline_mode<synchronous>, transform_indices = @transform_2, window_bounds = array<i64: 1, 128>}, {pipeline_mode = #tpu.pipeline_mode<synchronous>, transform_indices = @transform_3, window_bounds = array<i64: 128, 128>}, {pipeline_mode = #tpu.pipeline_mode<synchronous>, transform_indices = @transform_4, window_bounds = array<i64: 1, 128>}, {transform_indices = @transform_5, window_bounds = array<i64: 8, 128>}]} {
    %c0 = arith.constant 0 : index
    %c0_0 = arith.constant 0 : index
    %0 = vector.load %arg1[%c0, %c0_0] : memref<8x32xf32, #tpu.memory_space<vmem>>, vector<8x32xf32>
    %c0_1 = arith.constant 0 : index
    %c0_2 = arith.constant 0 : index
    %1 = vector.load %arg2[%c0_1, %c0_2] : memref<32x128xbf16, #tpu.memory_space<vmem>>, vector<32x128xbf16>
    %c0_3 = arith.constant 0 : index
    %c0_4 = arith.constant 0 : index
    %2 = vector.load %arg3[%c0_3, %c0_4] : memref<1x128xf32, #tpu.memory_space<vmem>>, vector<1x128xf32>
    %c0_5 = arith.constant 0 : index
    %c0_6 = arith.constant 0 : index
    %3 = vector.load %arg4[%c0_5, %c0_6] : memref<128x128xbf16, #tpu.memory_space<vmem>>, vector<128x128xbf16>
    %c0_7 = arith.constant 0 : index
    %c0_8 = arith.constant 0 : index
    %4 = vector.load %arg5[%c0_7, %c0_8] : memref<1x128xf32, #tpu.memory_space<vmem>>, vector<1x128xf32>
    %5 = arith.truncf %0 : vector<8x32xf32> to vector<8x32xbf16>
    %cst = arith.constant dense<0.000000e+00> : vector<8x128xf32>
    %6 = tpu.matmul %5, %1, %cst {dimension_numbers = #tpu.dot_dimension_numbers<[1], [0], [0], [1], [0, 0, 1, 1], [], []>} : vector<8x32xbf16>, vector<32x128xbf16>, vector<8x128xf32> -> vector<8x128xf32>
    %7 = vector.broadcast %2 : vector<1x128xf32> to vector<8x128xf32>
    %8 = arith.addf %6, %7 : vector<8x128xf32>
    %9 = math.tanh %8 : vector<8x128xf32>
    %10 = arith.truncf %9 : vector<8x128xf32> to vector<8x128xbf16>
    %cst_9 = arith.constant dense<0.000000e+00> : vector<8x128xf32>
    %11 = tpu.matmul %10, %3, %cst_9 {dimension_numbers = #tpu.dot_dimension_numbers<[1], [0], [0], [1], [0, 0, 1, 1], [], []>} : vector<8x128xbf16>, vector<128x128xbf16>, vector<8x128xf32> -> vector<8x128xf32>
    %12 = vector.broadcast %4 : vector<1x128xf32> to vector<8x128xf32>
    %13 = arith.addf %11, %12 : vector<8x128xf32>
    %14 = math.tanh %13 : vector<8x128xf32>
    %c0_10 = arith.constant 0 : index
    %c0_11 = arith.constant 0 : index
    %15 = vector.load %arg6[%c0_10, %c0_11] : memref<8x128xf32, #tpu.memory_space<vmem>>, vector<8x128xf32>
    tpu.vector_store %arg6[%c0_10, %c0_11], %14 {strides = array<i32>} : memref<8x128xf32, #tpu.memory_space<vmem>>, vector<8x128xf32>,
    return
  }
  func.func @transform_0(%arg0: i32) -> (i32, i32) {
    %c0_i32 = arith.constant 0 : i32
    %c0_i32_0 = arith.constant 0 : i32
    return %arg0, %c0_i32 : i32, i32
  }
  func.func @transform_1(%arg0: i32) -> (i32, i32) {
    %c0_i32 = arith.constant 0 : i32
    %c0_i32_0 = arith.constant 0 : i32
    %c0_i32_1 = arith.constant 0 : i32
    return %c0_i32, %c0_i32_0 : i32, i32
  }
  func.func @transform_2(%arg0: i32) -> (i32, i32) {
    %c0_i32 = arith.constant 0 : i32
    %c0_i32_0 = arith.constant 0 : i32
    %c0_i32_1 = arith.constant 0 : i32
    return %c0_i32, %c0_i32_0 : i32, i32
  }
  func.func @transform_3(%arg0: i32) -> (i32, i32) {
    %c0_i32 = arith.constant 0 : i32
    %c0_i32_0 = arith.constant 0 : i32
    %c0_i32_1 = arith.constant 0 : i32
    return %c0_i32, %c0_i32_0 : i32, i32
  }
  func.func @transform_4(%arg0: i32) -> (i32, i32) {
    %c0_i32 = arith.constant 0 : i32
    %c0_i32_0 = arith.constant 0 : i32
    %c0_i32_1 = arith.constant 0 : i32
    return %c0_i32, %c0_i32_0 : i32, i32
  }
  func.func @transform_5(%arg0: i32) -> (i32, i32) {
    %c0_i32 = arith.constant 0 : i32
    %c0_i32_0 = arith.constant 0 : i32
    return %arg0, %c0_i32 : i32, i32
  }
}

</mosaic_0001>

<bundles_post_ra>
// kernel: tpu_custom_call.1
= control target key start
LH: loop header
LB: loop body
LE: loop exit
PB: predicated region body
PF: predicated region fallthrough
CT: control target
= control target key end

     0   :  { %10 = vsyncpa [#allocation3], 0  ;;  %s528_s0 = inlined_call_operand.hbm [shape: f32[8,32], index: 0, kind: input, shape index: {}]   ;;  %s529_s1 = inlined_call_operand.hbm [shape: bf16[32,128], index: 1, kind: input, shape index: {}]   ;;  %s530_s2 = inlined_call_operand.vmem [shape: f32[1,128], index: 2, kind: input, shape index: {}]   ;;  %s531_s3 = inlined_call_operand.hbm [shape: bf16[128,128], index: 3, kind: input, shape index: {}]   ;;  %s532_s4 = inlined_call_operand.vmem [shape: f32[1,128], index: 4, kind: input, shape index: {}]   ;;  %s533_s5 = inlined_call_operand.hbm [shape: f32[8,128], index: 5, kind: output, shape index: {}]  }
   0x1   :  { %11 = vsyncpa [#allocation6], 0 }
   0x2   :  { %12 = vsyncpa [#allocation4], 0  ;;  %s430_s18 = smov [#allocation5]   ;;  %s336_s22 = scalar_lea.hbm %s529_s1, 256 }
   0x3   :  { %s28_s19 = sshll.u32 %s430_s18, 4  ;;  %p337_p0 = scmp.ne.s32.totalorder %s529_s1, %s336_s22  ;;  %s29_s19 = int_to_ptr.vmem [resolvable:$true] %s28_s19 }
   0x4   :  { %p340_p1 = scmp.lt.u32.totalorder %s336_s22, %s529_s1 }
   0x6   :  { %p342_p2 = pnand %p340_p1, %p337_p0 }
   0x8   :  { %345 = shalt.err (!%p342_p2)
}
   0x9   :  { %s346_s27 = scalar_lea.vmem %s29_s19, 256  ;;  %p351_p4 = scmp.lt.s32.totalorder %s29_s19, %s29_s19 }
   0xa   :  { %p347_p3 = scmp.ne.s32.totalorder %s29_s19, %s346_s27  ;;  %p352_p5 = scmp.lt.s32.totalorder %s346_s27, %s346_s27 }
   0xc   :  { %p353_p6 = por %p352_p5, %p351_p4 }
   0xe   :  { %p354_p7 = pnand %p353_p6, %p347_p3 }
  0x10   :  { %357 = shalt.err (!%p354_p7)
}
  0x11   :  { %s431_s28 = smov 64   ;;  %s432_s29 = smov 4  }
  0x12   :  { %34 = dma.hbm_to_vmem [thread:$0]  %s529_s1, 256, %s29_s19, [#allocation6], %s431_s28, %s431_s28, %s432_s29  }
  0x13   :  { %s433_s7 = smov [#allocation2]   ;;  %s434_s9 = smov [#allocation7]  }
  0x14   :  { %s19_s8 = sshll.u32 %s433_s7, 4  ;;  %s42_s10 = sshll.u32 %s434_s9, 4  ;;  %s20_s8 = int_to_ptr.vmem [resolvable:$true] %s19_s8  ;;  %s43_s10 = int_to_ptr.vmem [resolvable:$true] %s42_s10 }
  0x15   :  { %s358_s13 = scalar_lea.hbm %s528_s0, 128 }
  0x16   :  { %p359_p8 = scmp.ne.s32.totalorder %s528_s0, %s358_s13  ;;  %p362_p9 = scmp.lt.u32.totalorder %s358_s13, %s528_s0 }
  0x18   :  { %p364_p10 = pnand %p362_p9, %p359_p8 }
  0x1a   :  { %367 = shalt.err (!%p364_p10)
}
  0x1b   :  { %s368_s1 = scalar_lea.vmem %s20_s8, 128  ;;  %p373_p12 = scmp.lt.s32.totalorder %s20_s8, %s20_s8 }
  0x1c   :  { %p369_p11 = scmp.ne.s32.totalorder %s20_s8, %s368_s1  ;;  %p374_p13 = scmp.lt.s32.totalorder %s368_s1, %s368_s1 }
  0x1e   :  { %p375_p0 = por %p374_p13, %p373_p12 }
  0x20   :  { %p376_p1 = pnand %p375_p0, %p369_p11 }
  0x22   :  { %379 = shalt.err (!%p376_p1)
}
  0x23   :  { %22 = dma.hbm_to_vmem [thread:$0]  %s528_s0, 128, %s20_s8, [#allocation3]  }
  0x24   :  { %s380_s22 = scalar_lea.hbm %s531_s3, 1024 }
  0x25   :  { %p381_p2 = scmp.ne.s32.totalorder %s531_s3, %s380_s22  ;;  %p384_p3 = scmp.lt.u32.totalorder %s380_s22, %s531_s3 }
  0x27   :  { %p386_p4 = pnand %p384_p3, %p381_p2 }
  0x29   :  { %389 = shalt.err (!%p386_p4)
}
  0x2a   :  { %s390_s27 = scalar_lea.vmem %s43_s10, 1024  ;;  %p395_p6 = scmp.lt.s32.totalorder %s43_s10, %s43_s10 }
  0x2b   :  { %p391_p5 = scmp.ne.s32.totalorder %s43_s10, %s390_s27  ;;  %p396_p7 = scmp.lt.s32.totalorder %s390_s27, %s390_s27 }
  0x2d   :  { %p397_p8 = por %p396_p7, %p395_p6 }
  0x2f   :  { %p398_p9 = pnand %p397_p8, %p391_p5 }
  0x31   :  { %401 = shalt.err (!%p398_p9)
}
  0x32   :  { %48 = dma.hbm_to_vmem [thread:$0]  %s531_s3, 1024, %s43_s10, [#allocation6], %s431_s28, %s431_s28, %s432_s29  }
  0x33   :  { %424 = dma.done.wait [#allocation3], 128  }
  0x34   :  { %425 = vsyncadd [#allocation3], 4294967168 }
  0x35   :  { %426 = dma.done.wait [#allocation6], 1280  }
  0x36   :  { %427 = vsyncadd [#allocation6], 4294966016  ;;  %v435_v0 = vmov 0.0   ;;  %vm436_vm0 = vmmov 0   ;;  %v322_v1 = vld [vmem:[#allocation5] sm:$0xff]   ;;  %v323_v2 = vld [vmem:[#allocation5 + $0x8] sm:$0xff]  }
  0x37   :  { %286 = vmatprep.subr.bf16.mxu0 %v435_v0  ;;  %290 = vmatprep.mubr.msk.bf16.mxu0 %vm436_vm0, %v435_v0  ;;  %v61_v3 = vld [vmem:[#allocation2] sm:$0xff]  ;;  %v324_v4 = vld [vmem:[#allocation7] sm:$0xff]   ;;  %vm103_vm1 = vcmask 261120   ;;  %v326_v7 = vld [vmem:[#allocation7 + $0x10] sm:$0xff]  }
  0x38   :  { %294 = vmatprep.subr.bf16.mxu1 %v435_v0  ;;  %310 = vmatprep.mubr.msk.bf16.mxu1 %vm436_vm0, %v435_v0  ;;  %v84_v5 = vpack.c.bf16 %v61_v3, %v61_v3  ;;  %v325_v6 = vld [vmem:[#allocation7 + $0x8] sm:$0xff]   ;;  %v327_v8 = vld [vmem:[#allocation7 + $0x18] sm:$0xff]   ;;  %v328_v9 = vld [vmem:[#allocation7 + $0x20] sm:$0xff]  }
  0x39   :  { %287 = vmatpush3.bf16.msra.mxu0 %v322_v1  ;;  %295 = vmatpush3.bf16.msra.mxu1 %v324_v4  ;;  %v329_v10 = vld [vmem:[#allocation7 + $0x28] sm:$0xff]   ;;  %v330_v11 = vld [vmem:[#allocation7 + $0x30] sm:$0xff]   ;;  %v331_v12 = vld [vmem:[#allocation7 + $0x38] sm:$0xff]  }
  0x3a   :  { %288 = vmatprep.subr.bf16.mxu0 %v435_v0  ;;  %296 = vmatprep.subr.bf16.mxu1 %v435_v0  ;;  %v261_v13 = vld [vmem:[%s530_s2] ss:$0 sm:$0xff]  ;;  %s437_s2 = smov [#allocation8]  }
  0x3b   :  { %v265_v21 = vld [vmem:[%s532_s4] ss:$0 sm:$0xff]  ;;  %s251_s7 = sshll.u32 %s437_s2, 4  ;;  %s252_s7 = int_to_ptr.vmem [resolvable:$true] %s251_s7 }
  0x3c   :  { %s402_s8 = scalar_lea.vmem %s252_s7, 128  ;;  %p407_p11 = scmp.lt.s32.totalorder %s252_s7, %s252_s7 }
  0x3d   :  { %289 = vmatpush3.bf16.msra.mxu0 %v323_v2  ;;  %297 = vmatpush3.bf16.msra.mxu1 %v325_v6  ;;  %p403_p10 = scmp.ne.s32.totalorder %s252_s7, %s402_s8  ;;  %p408_p12 = scmp.lt.s32.totalorder %s402_s8, %s402_s8 }
  0x3e   :  { %298 = vmatprep.subr.bf16.mxu1 %v435_v0 }
  0x3f   :  { %p409_p13 = por %p408_p12, %p407_p11 }
  0x40   :  { %291 = vmatmul.mubr.msk.bf16.vlgmr.msra.gmra.mrb[0].mxu0 %vm103_vm1, %v84_v5 }
  0x41   :  { %299 = vmatpush3.bf16.msra.mxu1 %v326_v7  ;;  %p410_p0 = pnand %p409_p13, %p403_p10 }
  0x42   :  { %300 = vmatprep.subr.bf16.mxu1 %v435_v0 }
  0x45   :  { %301 = vmatpush3.bf16.msra.mxu1 %v327_v8 }
  0x46   :  { %302 = vmatprep.subr.bf16.mxu1 %v435_v0 }
  0x49   :  { %303 = vmatpush3.bf16.msra.mxu1 %v328_v9 }
  0x4a   :  { %304 = vmatprep.subr.bf16.mxu1 %v435_v0 }
  0x4d   :  { %305 = vmatpush3.bf16.msra.mxu1 %v329_v10 }
  0x4e   :  { %306 = vmatprep.subr.bf16.mxu1 %v435_v0 }
  0x51   :  { %307 = vmatpush3.bf16.msra.mxu1 %v330_v11 }
  0x52   :  { %308 = vmatprep.subr.bf16.mxu1 %v435_v0 }
  0x55   :  { %309 = vmatpush3.bf16.msra.mxu1 %v331_v12 }
 0x113   :  { %v141_v14 = vpop.f32.mrb[0].mxu0 }
 0x114   :  { %v142_v15 = vadd.f32 %v261_v13, %v141_v14  ;;  %v292_v16 = vpop.f32.mrb[1].mxu0 }
 0x115   :  { %v144_v17 = vpop.f32.mrb[2].mxu0 }
 0x116   :  { %332 = vtanh.f32 %v142_v15  ;;  %v293_v18 = vpop.f32.mrb[3].mxu0 }
 0x120   :  { %v333_v19 = vpop.eup %332 }
 0x121   :  { %v148_v20 = vpack.c.bf16 %v333_v19, %v333_v19 }
 0x123   :  { %311 = vmatmul.mubr.bf16.vlgmr.msra.gmra.mrb[0].mxu1 %v148_v20 }
 0x1f6   :  { %v237_v22 = vpop.f32.mrb[0].mxu1 }
 0x1f7   :  { %v238_v23 = vadd.f32 %v265_v21, %v237_v22  ;;  %v312_v24 = vpop.f32.mrb[1].mxu1 }
 0x1f8   :  { %v240_v25 = vpop.f32.mrb[2].mxu1 }
 0x1f9   :  { %334 = vtanh.f32 %v238_v23  ;;  %v313_v26 = vpop.f32.mrb[3].mxu1 }
 0x203   :  { %v335_v27 = vpop.eup %334 }
 0x204   :  { %244 = vst [vmem:[#allocation8] sm:$0xff] %v335_v27 }
 0x205   :  { %413 = shalt.err (!%p410_p0)
}
 0x206   :  { %s414_s10 = scalar_lea.hbm %s533_s5, 128 }
 0x207   :  { %p415_p1 = scmp.ne.s32.totalorder %s533_s5, %s414_s10  ;;  %p418_p2 = scmp.lt.u32.totalorder %s414_s10, %s533_s5 }
 0x209   :  { %p420_p3 = pnand %p418_p2, %p415_p1 }
 0x20b   :  { %423 = shalt.err (!%p420_p3)
}
 0x20c   :  { %254 = dma.vmem_to_hbm [thread:$0]  %s252_s7, 128, %s533_s5, [#allocation4]  }
 0x20d   :  { %428 = dma.done.wait [#allocation4], 128  }
 0x20e   :  { %429 = vsyncadd [#allocation4], 4294967168 }
 0x20f   :  { %258 = vsyncpa [#allocation3], 1 }
 0x210   :  { %259 = vsyncpa [#allocation6], 1 }
 0x211   :  { %260 = vsyncpa [#allocation4], 1 }

// kernel: tpu_custom_call.1
= control target key start
LH: loop header
LB: loop body
LE: loop exit
PB: predicated region body
PF: predicated region fallthrough
CT: control target
= control target key end

     0   :  { %10 = vsyncpa [#allocation3], 0  ;;  %s528_s0 = inlined_call_operand.hbm [shape: f32[8,32], index: 0, kind: input, shape index: {}]   ;;  %s529_s1 = inlined_call_operand.hbm [shape: bf16[32,128], index: 1, kind: input, shape index: {}]   ;;  %s530_s2 = inlined_call_operand.vmem [shape: f32[1,128], index: 2, kind: input, shape index: {}]   ;;  %s531_s3 = inlined_call_operand.hbm [shape: bf16[128,128], index: 3, kind: input, shape index: {}]   ;;  %s532_s4 = inlined_call_operand.vmem [shape: f32[1,128], index: 4, kind: input, shape index: {}]   ;;  %s533_s5 = inlined_call_operand.hbm [shape: f32[8,128], index: 5, kind: output, shape index: {}]  }
   0x1   :  { %11 = vsyncpa [#allocation6], 0 }
   0x2   :  { %12 = vsyncpa [#allocation4], 0  ;;  %s430_s18 = smov [#allocation5]   ;;  %s336_s22 = scalar_lea.hbm %s529_s1, 256 }
   0x3   :  { %s28_s19 = sshll.u32 %s430_s18, 4  ;;  %p337_p0 = scmp.ne.s32.totalorder %s529_s1, %s336_s22  ;;  %s29_s19 = int_to_ptr.vmem [resolvable:$true] %s28_s19 }
   0x4   :  { %p340_p1 = scmp.lt.u32.totalorder %s336_s22, %s529_s1 }
   0x6   :  { %p342_p2 = pnand %p340_p1, %p337_p0 }
   0x8   :  { %345 = shalt.err (!%p342_p2)
}
   0x9   :  { %s346_s27 = scalar_lea.vmem %s29_s19, 256  ;;  %p351_p4 = scmp.lt.s32.totalorder %s29_s19, %s29_s19 }
   0xa   :  { %p347_p3 = scmp.ne.s32.totalorder %s29_s19, %s346_s27  ;;  %p352_p5 = scmp.lt.s32.totalorder %s346_s27, %s346_s27 }
   0xc   :  { %p353_p6 = por %p352_p5, %p351_p4 }
   0xe   :  { %p354_p7 = pnand %p353_p6, %p347_p3 }
  0x10   :  { %357 = shalt.err (!%p354_p7)
}
  0x11   :  { %s431_s28 = smov 64   ;;  %s432_s29 = smov 4  }
  0x12   :  { %34 = dma.hbm_to_vmem [thread:$0]  %s529_s1, 256, %s29_s19, [#allocation6], %s431_s28, %s431_s28, %s432_s29  }
  0x13   :  { %s433_s7 = smov [#allocation2]   ;;  %s434_s9 = smov [#allocation7]  }
  0x14   :  { %s19_s8 = sshll.u32 %s433_s7, 4  ;;  %s42_s10 = sshll.u32 %s434_s9, 4  ;;  %s20_s8 = int_to_ptr.vmem [resolvable:$true] %s19_s8  ;;  %s43_s10 = int_to_ptr.vmem [resolvable:$true] %s42_s10 }
  0x15   :  { %s358_s13 = scalar_lea.hbm %s528_s0, 128 }
  0x16   :  { %p359_p8 = scmp.ne.s32.totalorder %s528_s0, %s358_s13  ;;  %p362_p9 = scmp.lt.u32.totalorder %s358_s13, %s528_s0 }
  0x18   :  { %p364_p10 = pnand %p362_p9, %p359_p8 }
  0x1a   :  { %367 = shalt.err (!%p364_p10)
}
  0x1b   :  { %s368_s1 = scalar_lea.vmem %s20_s8, 128  ;;  %p373_p12 = scmp.lt.s32.totalorder %s20_s8, %s20_s8 }
  0x1c   :  { %p369_p11 = scmp.ne.s32.totalorder %s20_s8, %s368_s1  ;;  %p374_p13 = scmp.lt.s32.totalorder %s368_s1, %s368_s1 }
  0x1e   :  { %p375_p0 = por %p374_p13, %p373_p12 }
  0x20   :  { %p376_p1 = pnand %p375_p0, %p369_p11 }
  0x22   :  { %379 = shalt.err (!%p376_p1)
}
  0x23   :  { %22 = dma.hbm_to_vmem [thread:$0]  %s528_s0, 128, %s20_s8, [#allocation3]  }
  0x24   :  { %s380_s22 = scalar_lea.hbm %s531_s3, 1024 }
  0x25   :  { %p381_p2 = scmp.ne.s32.totalorder %s531_s3, %s380_s22  ;;  %p384_p3 = scmp.lt.u32.totalorder %s380_s22, %s531_s3 }
  0x27   :  { %p386_p4 = pnand %p384_p3, %p381_p2 }
  0x29   :  { %389 = shalt.err (!%p386_p4)
}
  0x2a   :  { %s390_s27 = scalar_lea.vmem %s43_s10, 1024  ;;  %p395_p6 = scmp.lt.s32.totalorder %s43_s10, %s43_s10 }
  0x2b   :  { %p391_p5 = scmp.ne.s32.totalorder %s43_s10, %s390_s27  ;;  %p396_p7 = scmp.lt.s32.totalorder %s390_s27, %s390_s27 }
  0x2d   :  { %p397_p8 = por %p396_p7, %p395_p6 }
  0x2f   :  { %p398_p9 = pnand %p397_p8, %p391_p5 }
  0x31   :  { %401 = shalt.err (!%p398_p9)
}
  0x32   :  { %48 = dma.hbm_to_vmem [thread:$0]  %s531_s3, 1024, %s43_s10, [#allocation6], %s431_s28, %s431_s28, %s432_s29  }
  0x33   :  { %424 = dma.done.wait [#allocation3], 128  }
  0x34   :  { %425 = vsyncadd [#allocation3], 4294967168 }
  0x35   :  { %426 = dma.done.wait [#allocation6], 1280  }
  0x36   :  { %427 = vsyncadd [#allocation6], 4294966016  ;;  %v435_v0 = vmov 0.0   ;;  %vm436_vm0 = vmmov 0   ;;  %v322_v1 = vld [vmem:[#allocation5] sm:$0xff]   ;;  %v323_v2 = vld [vmem:[#allocation5 + $0x8] sm:$0xff]  }
  0x37   :  { %286 = vmatprep.subr.bf16.mxu0 %v435_v0  ;;  %290 = vmatprep.mubr.msk.bf16.mxu0 %vm436_vm0, %v435_v0  ;;  %v61_v3 = vld [vmem:[#allocation2] sm:$0xff]  ;;  %v324_v4 = vld [vmem:[#allocation7] sm:$0xff]   ;;  %vm103_vm1 = vcmask 261120   ;;  %v326_v7 = vld [vmem:[#allocation7 + $0x10] sm:$0xff]  }
  0x38   :  { %294 = vmatprep.subr.bf16.mxu1 %v435_v0  ;;  %310 = vmatprep.mubr.msk.bf16.mxu1 %vm436_vm0, %v435_v0  ;;  %v84_v5 = vpack.c.bf16 %v61_v3, %v61_v3  ;;  %v325_v6 = vld [vmem:[#allocation7 + $0x8] sm:$0xff]   ;;  %v327_v8 = vld [vmem:[#allocation7 + $0x18] sm:$0xff]   ;;  %v328_v9 = vld [vmem:[#allocation7 + $0x20] sm:$0xff]  }
  0x39   :  { %287 = vmatpush3.bf16.msra.mxu0 %v322_v1  ;;  %295 = vmatpush3.bf16.msra.mxu1 %v324_v4  ;;  %v329_v10 = vld [vmem:[#allocation7 + $0x28] sm:$0xff]   ;;  %v330_v11 = vld [vmem:[#allocation7 + $0x30] sm:$0xff]   ;;  %v331_v12 = vld [vmem:[#allocation7 + $0x38] sm:$0xff]  }
  0x3a   :  { %288 = vmatprep.subr.bf16.mxu0 %v435_v0  ;;  %296 = vmatprep.subr.bf16.mxu1 %v435_v0  ;;  %v261_v13 = vld [vmem:[%s530_s2] ss:$0 sm:$0xff]  ;;  %s437_s2 = smov [#allocation8]  }
  0x3b   :  { %v265_v21 = vld [vmem:[%s532_s4] ss:$0 sm:$0xff]  ;;  %s251_s7 = sshll.u32 %s437_s2, 4  ;;  %s252_s7 = int_to_ptr.vmem [resolvable:$true] %s251_s7 }
  0x3c   :  { %s402_s8 = scalar_lea.vmem %s252_s7, 128  ;;  %p407_p11 = scmp.lt.s32.totalorder %s252_s7, %s252_s7 }
  0x3d   :  { %289 = vmatpush3.bf16.msra.mxu0 %v323_v2  ;;  %297 = vmatpush3.bf16.msra.mxu1 %v325_v6  ;;  %p403_p10 = scmp.ne.s32.totalorder %s252_s7, %s402_s8  ;;  %p408_p12 = scmp.lt.s32.totalorder %s402_s8, %s402_s8 }
  0x3e   :  { %298 = vmatprep.subr.bf16.mxu1 %v435_v0 }
  0x3f   :  { %p409_p13 = por %p408_p12, %p407_p11 }
  0x40   :  { %291 = vmatmul.mubr.msk.bf16.vlgmr.msra.gmra.mrb[0].mxu0 %vm103_vm1, %v84_v5 }
  0x41   :  { %299 = vmatpush3.bf16.msra.mxu1 %v326_v7  ;;  %p410_p0 = pnand %p409_p13, %p403_p10 }
  0x42   :  { %300 = vmatprep.subr.bf16.mxu1 %v435_v0 }
  0x45   :  { %301 = vmatpush3.bf16.msra.mxu1 %v327_v8 }
  0x46   :  { %302 = vmatprep.subr.bf16.mxu1 %v435_v0 }
  0x49   :  { %303 = vmatpush3.bf16.msra.mxu1 %v328_v9 }
  0x4a   :  { %304 = vmatprep.subr.bf16.mxu1 %v435_v0 }
  0x4d   :  { %305 = vmatpush3.bf16.msra.mxu1 %v329_v10 }
  0x4e   :  { %306 = vmatprep.subr.bf16.mxu1 %v435_v0 }
  0x51   :  { %307 = vmatpush3.bf16.msra.mxu1 %v330_v11 }
  0x52   :  { %308 = vmatprep.subr.bf16.mxu1 %v435_v0 }
  0x55   :  { %309 = vmatpush3.bf16.msra.mxu1 %v331_v12 }
 0x113   :  { %v141_v14 = vpop.f32.mrb[0].mxu0 }
 0x114   :  { %v142_v15 = vadd.f32 %v261_v13, %v141_v14  ;;  %v292_v16 = vpop.f32.mrb[1].mxu0 }
 0x115   :  { %v144_v17 = vpop.f32.mrb[2].mxu0 }
 0x116   :  { %332 = vtanh.f32 %v142_v15  ;;  %v293_v18 = vpop.f32.mrb[3].mxu0 }
 0x120   :  { %v333_v19 = vpop.eup %332 }
 0x121   :  { %v148_v20 = vpack.c.bf16 %v333_v19, %v333_v19 }
 0x123   :  { %311 = vmatmul.mubr.bf16.vlgmr.msra.gmra.mrb[0].mxu1 %v148_v20 }
 0x1f6   :  { %v237_v22 = vpop.f32.mrb[0].mxu1 }
 0x1f7   :  { %v238_v23 = vadd.f32 %v265_v21, %v237_v22  ;;  %v312_v24 = vpop.f32.mrb[1].mxu1 }
 0x1f8   :  { %v240_v25 = vpop.f32.mrb[2].mxu1 }
 0x1f9   :  { %334 = vtanh.f32 %v238_v23  ;;  %v313_v26 = vpop.f32.mrb[3].mxu1 }
 0x203   :  { %v335_v27 = vpop.eup %334 }
 0x204   :  { %244 = vst [vmem:[#allocation8] sm:$0xff] %v335_v27 }
 0x205   :  { %413 = shalt.err (!%p410_p0)
}
 0x206   :  { %s414_s10 = scalar_lea.hbm %s533_s5, 128 }
 0x207   :  { %p415_p1 = scmp.ne.s32.totalorder %s533_s5, %s414_s10  ;;  %p418_p2 = scmp.lt.u32.totalorder %s414_s10, %s533_s5 }
 0x209   :  { %p420_p3 = pnand %p418_p2, %p415_p1 }
 0x20b   :  { %423 = shalt.err (!%p420_p3)
}
 0x20c   :  { %254 = dma.vmem_to_hbm [thread:$0]  %s252_s7, 128, %s533_s5, [#allocation4]  }
 0x20d   :  { %428 = dma.done.wait [#allocation4], 128  }
 0x20e   :  { %429 = vsyncadd [#allocation4], 4294967168 }
 0x20f   :  { %258 = vsyncpa [#allocation3], 1 }
 0x210   :  { %259 = vsyncpa [#allocation6], 1 }
 0x211   :  { %260 = vsyncpa [#allocation4], 1 }

</bundles_post_ra>
